<compile_context>
chip_gen: v5e
topology: v5e:2x2
jax: 0.10.0
libtpu: 0.0.40
codegen_flags: <defaults>
</compile_context>

<pallas_src>
import functools

import jax
import jax.numpy as jnp
from jax.experimental import pallas as pl
from jax.experimental.pallas import tpu as pltpu


def _round_up(a: int, m: int) -> int:
    return (a + m - 1) // m * m


def film_kernel(x_ref, tom_ref, w_ref, b_ref, o_ref, *, f_pad):
    # Single fused generator matmul: (tm, film_in) @ (film_in, 2*Fp)
    # -> [ weight | bias ], f32 accumulation on the MXU.
    gen = jnp.dot(tom_ref[...], w_ref[...],
                  preferred_element_type=jnp.float32) + b_ref[...]
    # Lane-aligned split (f_pad is a multiple of 128): no cross-lane relayout.
    weight = gen[:, :f_pad]
    bias = gen[:, f_pad:]
    # FiLM modulation (elementwise, VPU); cast only on the final store.
    o_ref[...] = (weight * x_ref[...] + bias).astype(o_ref.dtype)


def prepare_film_params(wg, bg, wb, bb, *, compute_dtype=None):
    """One-time parameter glue (hoisted out of the per-call path).

    wg/wb: PyTorch-layout Linear weights (film_out, film_in); bg/bb: (film_out,).
    Pads film_out up to a multiple of 128 so the in-kernel split and the output
    store are lane-dense, then concatenates: W_cat (film_in, 2*Fp), b_cat (1, 2*Fp).
    Optionally stores W_cat/b_cat in `compute_dtype` (e.g. bf16) to halve the
    resident-weight VMEM/DMA cost; the kernel's dot still accumulates in f32.
    """
    film_out, film_in = wg.shape
    f_pad = _round_up(film_out, 128)
    pad_cols = f_pad - film_out

    def prep_w(w):                       # (out, in) -> (in, Fp)
        wt = w.T
        if pad_cols:
            wt = jnp.pad(wt, ((0, 0), (0, pad_cols)))
        return wt

    def prep_b(b):                       # (out,) -> (Fp,)
        return jnp.pad(b, (0, pad_cols)) if pad_cols else b

    w_cat = jnp.concatenate([prep_w(wg), prep_w(wb)], axis=1)        # (K, 2*Fp)
    b_cat = jnp.concatenate([prep_b(bg), prep_b(bb)]).reshape(1, -1)  # (1, 2*Fp)
    if compute_dtype is not None:
        w_cat = w_cat.astype(compute_dtype)
        b_cat = b_cat.astype(compute_dtype)
    return w_cat, b_cat


def film_forward(x, tom, w_cat, b_cat, *, block_rows=256):
    """x: (B, film_out), tom: (B, film_in); fused params from prepare_film_params."""
    B, film_out = x.shape
    _, film_in = tom.shape
    f_pad = w_cat.shape[1] // 2
    assert w_cat.shape == (film_in, 2 * f_pad)
    assert b_cat.shape == (1, 2 * f_pad)
    assert f_pad >= film_out and f_pad % 128 == 0

    # Pad x columns to the lane-aligned width (no-op when already aligned).
    xp = x if f_pad == film_out else jnp.pad(x, ((0, 0), (0, f_pad - film_out)))

    x_isz = jnp.dtype(xp.dtype).itemsize
    tom_isz = jnp.dtype(tom.dtype).itemsize
    w_isz = jnp.dtype(w_cat.dtype).itemsize
    b_isz = jnp.dtype(b_cat.dtype).itemsize

    # Sublane granularity for the row (second-minor) axis: 8 for 32-bit,
    # 16 for 16-bit dtypes.
    sublane = max(8, 32 // x_isz)

    # Batch tile selection: once B is big enough, aim for 2–4 grid steps so the
    # BlockSpec pipeline actually overlaps (prefetch i+1 / write back i-1 under
    # compute of i) and v7x's 2 TensorCores can shard the parallel axis.
    if B < 2 * sublane:
        tm = B
    else:
        target_steps = max(2, min(4, B // 128))
        tm = min(block_rows, _round_up(pl.cdiv(B, target_steps), sublane))

    def vmem_footprint(rows):
        # x-in + out (double-buffered streams) + tom-in, plus resident fused
        # params (counted double-buffered to stay conservative).
        stream = 2 * rows * (f_pad * x_isz + film_in * tom_isz + f_pad * x_isz)
        resident = 2 * (film_in * 2 * f_pad * w_isz + 2 * f_pad * b_isz)
        return stream + resident

    # Conservative budget that fits every generation's scoped/physical VMEM
    # (v5e/v6e: 128 MiB phys, v7x: 64 MiB phys); shrink the batch tile if needed.
    vmem_budget = 40 * 1024 * 1024
    while tm > sublane and vmem_footprint(tm) > vmem_budget:
        tm = _round_up(max(sublane, tm // 2), sublane)

    # Raise the scoped-VMEM limit explicitly (v5e default is only 16 MiB);
    # cap at 48 MiB to keep headroom on v7x's 64 MiB physical VMEM.
    vmem_limit = int(min(48 * 1024 * 1024,
                         max(32 * 1024 * 1024, vmem_footprint(tm) + (4 << 20))))

    grid = (pl.cdiv(B, tm),)
    kernel = functools.partial(film_kernel, f_pad=f_pad)

    flops = 2 * B * film_in * (2 * f_pad) + 2 * B * f_pad
    bytes_accessed = (B * f_pad * x_isz * 2          # x in + out
                      + B * film_in * tom_isz        # tom
                      + film_in * 2 * f_pad * w_isz  # fused W (resident)
                      + 2 * f_pad * b_isz)           # fused b

    out_padded = pl.pallas_call(
        kernel,
        out_shape=jax.ShapeDtypeStruct((B, f_pad), x.dtype),
        grid=grid,
        in_specs=[
            pl.BlockSpec((tm, f_pad), lambda i: (i, 0)),              # x (padded)
            pl.BlockSpec((tm, film_in), lambda i: (i, 0)),            # tom
            pl.BlockSpec((film_in, 2 * f_pad), lambda i: (0, 0)),     # [Wg^T|Wb^T] resident
            pl.BlockSpec((1, 2 * f_pad), lambda i: (0, 0)),           # [bg|bb] resident
        ],
        out_specs=pl.BlockSpec((tm, f_pad), lambda i: (i, 0)),
        compiler_params=pltpu.CompilerParams(
            dimension_semantics=("parallel",),
            vmem_limit_bytes=vmem_limit),
        cost_estimate=pl.CostEstimate(
            flops=flops, transcendentals=0, bytes_accessed=bytes_accessed),
    )(xp, tom, w_cat, b_cat)

    # Strip the lane-alignment padding (no-op slice when film_out % 128 == 0).
    return out_padded if f_pad == film_out else out_padded[:, :film_out]


if __name__ == "__main__":
    # Small deterministic setup consistent with the module:
    # config = {'film_in': 16, 'film_out': 32}, batch = 8
    B, film_in, film_out = 8, 16, 32

    key = jax.random.PRNGKey(0)
    kx, kt, kwg, kbg, kwb, kbb = jax.random.split(key, 6)

    x = jax.random.normal(kx, (B, film_out), dtype=jnp.float32)
    tom = jax.random.normal(kt, (B, film_in), dtype=jnp.float32)

    # Deterministic parameter init (PyTorch Linear shapes: weight (out, in)).
    bound = 1.0 / (film_in ** 0.5)
    wg = jax.random.uniform(kwg, (film_out, film_in), jnp.float32, -bound, bound)
    bg = jax.random.uniform(kbg, (film_out,), jnp.float32, -bound, bound)
    wb = jax.random.uniform(kwb, (film_out, film_in), jnp.float32, -bound, bound)
    bb = jax.random.uniform(kbb, (film_out,), jnp.float32, -bound, bound)

    # One-time parameter preparation (transpose + pad + concat hoisted out of
    # the per-call path).  Pass compute_dtype=jnp.bfloat16 here for bf16 models.
    w_cat, b_cat = jax.block_until_ready(prepare_film_params(wg, bg, wb, bb))

    film = jax.jit(film_forward)
    out = jax.block_until_ready(film(x, tom, w_cat, b_cat))

    # Pure-JAX reference check against the original (unfused) formulation.
    ref = (tom @ wg.T + bg) * x + (tom @ wb.T + bb)
    assert out.shape == ref.shape
    assert jnp.allclose(out, ref, atol=1e-5, rtol=1e-5), "mismatch vs reference"

    print("KERNEL_OK")
</pallas_src>

<mosaic_0001>
module attributes {stable_mosaic.version = 11 : i64} {
  func.func @film_kernel(%arg0: i32, %arg1: memref<8x128xf32, #tpu.memory_space<vmem>>, %arg2: memref<8x16xf32, #tpu.memory_space<vmem>>, %arg3: memref<16x256xf32, #tpu.memory_space<vmem>>, %arg4: memref<1x256xf32, #tpu.memory_space<vmem>>, %arg5: memref<8x128xf32, #tpu.memory_space<vmem>>) attributes {dimension_semantics = [#tpu.dimension_semantics<parallel>], iteration_bounds = array<i64: 1>, scalar_prefetch = 0 : i64, scratch_operands = 0 : i64, tpu.core_type = #tpu.core_type<tc>, window_params = [{transform_indices = @transform_0, window_bounds = array<i64: 8, 128>}, {transform_indices = @transform_1, window_bounds = array<i64: 8, 16>}, {pipeline_mode = #tpu.pipeline_mode<synchronous>, transform_indices = @transform_2, window_bounds = array<i64: 16, 256>}, {pipeline_mode = #tpu.pipeline_mode<synchronous>, transform_indices = @transform_3, window_bounds = array<i64: 1, 256>}, {transform_indices = @transform_4, window_bounds = array<i64: 8, 128>}]} {
    %c0 = arith.constant 0 : index
    %c0_0 = arith.constant 0 : index
    %0 = vector.load %arg2[%c0, %c0_0] : memref<8x16xf32, #tpu.memory_space<vmem>>, vector<8x16xf32>
    %c0_1 = arith.constant 0 : index
    %c0_2 = arith.constant 0 : index
    %1 = vector.load %arg3[%c0_1, %c0_2] : memref<16x256xf32, #tpu.memory_space<vmem>>, vector<16x256xf32>
    %cst = arith.constant dense<0.000000e+00> : vector<8x256xf32>
    %2 = tpu.matmul %0, %1, %cst {dimension_numbers = #tpu.dot_dimension_numbers<[1], [0], [0], [1], [0, 0, 1, 1], [], []>} : vector<8x16xf32>, vector<16x256xf32>, vector<8x256xf32> -> vector<8x256xf32>
    %c0_3 = arith.constant 0 : index
    %c0_4 = arith.constant 0 : index
    %3 = vector.load %arg4[%c0_3, %c0_4] : memref<1x256xf32, #tpu.memory_space<vmem>>, vector<1x256xf32>
    %4 = vector.broadcast %3 : vector<1x256xf32> to vector<8x256xf32>
    %5 = arith.addf %2, %4 : vector<8x256xf32>
    %6 = vector.extract_strided_slice %5 {offsets = [0, 0], sizes = [8, 128], strides = [1, 1]} : vector<8x256xf32> to vector<8x128xf32>
    %7 = vector.extract_strided_slice %5 {offsets = [0, 128], sizes = [8, 128], strides = [1, 1]} : vector<8x256xf32> to vector<8x128xf32>
    %c0_5 = arith.constant 0 : index
    %c0_6 = arith.constant 0 : index
    %8 = vector.load %arg1[%c0_5, %c0_6] : memref<8x128xf32, #tpu.memory_space<vmem>>, vector<8x128xf32>
    %9 = arith.mulf %6, %8 : vector<8x128xf32>
    %10 = arith.addf %9, %7 : vector<8x128xf32>
    %c0_7 = arith.constant 0 : index
    %c0_8 = arith.constant 0 : index
    %11 = vector.load %arg5[%c0_7, %c0_8] : memref<8x128xf32, #tpu.memory_space<vmem>>, vector<8x128xf32>
    tpu.vector_store %arg5[%c0_7, %c0_8], %10 {strides = array<i32>} : memref<8x128xf32, #tpu.memory_space<vmem>>, vector<8x128xf32>,
    return
  }
  func.func @transform_0(%arg0: i32) -> (i32, i32) {
    %c0_i32 = arith.constant 0 : i32
    %c0_i32_0 = arith.constant 0 : i32
    return %arg0, %c0_i32 : i32, i32
  }
  func.func @transform_1(%arg0: i32) -> (i32, i32) {
    %c0_i32 = arith.constant 0 : i32
    %c0_i32_0 = arith.constant 0 : i32
    return %arg0, %c0_i32 : i32, i32
  }
  func.func @transform_2(%arg0: i32) -> (i32, i32) {
    %c0_i32 = arith.constant 0 : i32
    %c0_i32_0 = arith.constant 0 : i32
    %c0_i32_1 = arith.constant 0 : i32
    return %c0_i32, %c0_i32_0 : i32, i32
  }
  func.func @transform_3(%arg0: i32) -> (i32, i32) {
    %c0_i32 = arith.constant 0 : i32
    %c0_i32_0 = arith.constant 0 : i32
    %c0_i32_1 = arith.constant 0 : i32
    return %c0_i32, %c0_i32_0 : i32, i32
  }
  func.func @transform_4(%arg0: i32) -> (i32, i32) {
    %c0_i32 = arith.constant 0 : i32
    %c0_i32_0 = arith.constant 0 : i32
    return %arg0, %c0_i32 : i32, i32
  }
}

</mosaic_0001>

<bundles_post_ra>
// kernel: film_forward.1
= control target key start
LH: loop header
LB: loop body
LE: loop exit
PB: predicated region body
PF: predicated region fallthrough
CT: control target
= control target key end

     0   :  { %9 = vsyncpa [#allocation3], 0  ;;  %s212_s0 = inlined_call_operand.vmem [shape: f32[8,128], index: 0, kind: input, shape index: {}]   ;;  %s213_s1 = inlined_call_operand.vmem [shape: f32[8,16], index: 1, kind: input, shape index: {}]   ;;  %s214_s2 = inlined_call_operand.hbm [shape: f32[16,256], index: 2, kind: input, shape index: {}]   ;;  %s215_s3 = inlined_call_operand.vmem [shape: f32[1,256], index: 3, kind: input, shape index: {}]   ;;  %s216_s4 = inlined_call_operand.hbm [shape: f32[8,128], index: 4, kind: output, shape index: {}]  }
   0x1   :  { %10 = vsyncpa [#allocation4], 0  ;;  %s19_s17 = sshll.u32 %s214_s2, 4  ;;  %s168_s18 = smov [#allocation2]   ;;  %s20_s17 = int_to_ptr.hbm [resolvable:$true] %s19_s17 }
   0x2   :  { %s21_s19 = sshll.u32 %s168_s18, 4  ;;  %s169_s20 = smov 256   ;;  %s22_s19 = int_to_ptr.vmem [resolvable:$true] %s21_s19 }
   0x3   :  { %s170_s21 = smov 16  }
   0x4   :  { %27 = dma.hbm_to_vmem [thread:$0]  %s20_s17, 512, %s22_s19, [#allocation3], %s169_s20, %s169_s20, %s170_s21  }
   0x5   :  { %164 = dma.done.wait [#allocation3], 512  }
   0x6   :  { %165 = vsyncadd [#allocation3], 4294966784  ;;  %v37_v0 = vld [vmem:[#allocation2 + $0x10] sm:$0xff]  ;;  %v35_v1 = vld [vmem:[#allocation2] sm:$0xff]  ;;  %vm45_vm0 = vcmask 130048   ;;  %s100_s30 = sshll.u32 %s216_s4, 4  ;;  %s101_s30 = int_to_ptr.hbm [resolvable:$true] %s100_s30 }
   0x7   :  { %v38_v2 = vld [vmem:[#allocation2 + $0x18] sm:$0xff]  ;;  %63 = vmatpush.msra.mxu0 %v37_v0  ;;  %v34_v3 = vld [vmem:[%s213_s1] sm:$0xff]  ;;  %v36_v4 = vld [vmem:[#allocation2 + $0x8] sm:$0xff]  ;;  %s171_s1 = smov [#allocation5]  }
   0x8   :  { %83 = vmatpush.msra.mxu1 %v38_v2  ;;  %v39_v5 = vld [vmem:[%s215_s3] sm:$0x3]  ;;  %s98_s27 = sshll.u32 %s171_s1, 4  ;;  %s99_s27 = int_to_ptr.vmem [resolvable:$true] %s98_s27 }
   0x9   :  { %64 = vmatpush.msra.mxu0 %v35_v1  ;;  %v41_v6 = vperm.slane %v39_v5, 0  ;;  %v42_v7 = vperm.slane %v39_v5, 1  ;;  %v89_v9 = vld [vmem:[%s212_s0] sm:$0xff] }
   0xa   :  { %84 = vmatpush.msra.mxu1 %v36_v4  ;;  %110 = vmatmul.msk.f32.vlgmr.msra.gmra.mxu0 %vm45_vm0, %v34_v3 }
   0xb   :  { %111 = vmatmul.msk.f32.vlgmr.msra.gmra.mxu1 %vm45_vm0, %v34_v3 }
  0x87   :  { %v66_v8 = vpop.f32.mrf.mxu0 }
  0x88   :  { %v86_v10 = vpop.f32.mrf.mxu1  ;;  %v67_v11 = vadd.f32 %v66_v8, %v41_v6 }
  0x89   :  { %v87_v12 = vadd.f32 %v86_v10, %v42_v7 }
  0x8a   :  { %v90_v13 = vmul.f32 %v89_v9, %v67_v11 }
  0x8c   :  { %v91_v14 = vadd.f32 %v90_v13, %v87_v12 }
  0x8e   :  { %92 = vst [vmem:[#allocation5] sm:$0xff] %v91_v14 }
  0x8f   :  { %103 = dma.vmem_to_hbm [thread:$0]  %s99_s27, 128, %s101_s30, [#allocation4]  }
  0x90   :  { %166 = dma.done.wait [#allocation4], 128  }
  0x91   :  { %167 = vsyncadd [#allocation4], 4294967168 }
  0x92   :  { %108 = vsyncpa [#allocation3], 1 }
  0x93   :  { %109 = vsyncpa [#allocation4], 1 }

</bundles_post_ra>
